<compile_context>
chip_gen: v7x
topology: tpu7x:2x2x1
jax: 0.10.0
libtpu: 0.0.40
codegen_flags: <defaults>
</compile_context>

<pallas_src>
import functools
import math

import jax
import jax.numpy as jnp
from jax.experimental import pallas as pl
from jax.experimental.pallas import tpu as pltpu


def _round_up(x, m):
    return ((x + m - 1) // m) * m


def _default_bf16_epilogue():
    """bf16 relu/cast epilogue on chips with a bf16 VPU (v6e / v7x)."""
    try:
        kind = jax.devices()[0].device_kind.lower()
    except Exception:
        return True
    return not any(tag in kind for tag in ("v2", "v3", "v4", "v5"))


def _fused_decoder_kernel(theta_ref, coords_ref, w_ref, o_ref, xaug_ref, *,
                          layer_rows, c_out, bf16_eplg):
    # theta_ref : (1, C_in, T)       f32   pixel tile of theta
    # coords_ref: (1, C_crd, T)      f32   pixel tile of coords
    # w_ref     : (D, R_max, K_aug)  bf16  augmented weights (feat|coords|bias|pad)
    # o_ref     : (1, C_out, T)      f32
    # xaug_ref  : (K_aug, T)         bf16  persistent augmented activation buffer
    depth, _, k_aug = w_ref.shape
    c_in0 = theta_ref.shape[1]
    c_crd = coords_ref.shape[1]
    t = theta_ref.shape[2]
    aug_pad = _round_up(c_crd + 1, 8)     # coords + ones row, padded to 8 rows
    f_rows = k_aug - aug_pad              # 8-aligned feature-row region

    # ---- per-tile init of the augmented activation buffer -------------------
    # rows [0, f_rows): layer-0 features (theta), zero padded
    # rows [f_rows, k_aug): coords, a ones row (multiplies the bias column), pad
    # All stores start at 8-aligned offsets with 8-aligned sizes -> unmasked.
    feat = theta_ref[0]                                           # (C_in, T) f32
    if f_rows > c_in0:
        feat = jnp.concatenate(
            [feat, jnp.zeros((f_rows - c_in0, t), jnp.float32)], axis=0)
    xaug_ref[:f_rows, :] = feat.astype(jnp.bfloat16)

    aug = jnp.concatenate([coords_ref[0], jnp.ones((1, t), jnp.float32)], axis=0)
    if aug_pad > c_crd + 1:
        aug = jnp.concatenate(
            [aug, jnp.zeros((aug_pad - c_crd - 1, t), jnp.float32)], axis=0)
    xaug_ref[f_rows:, :] = aug.astype(jnp.bfloat16)

    # ---- layer chain: exactly one augmented MXU matmul per layer -------------
    for d in range(depth):
        last = d + 1 == depth
        rows = _round_up(c_out if last else layer_rows[d], 8)
        w_d = w_ref[d][:rows, :]                                  # static slice
        acc = jnp.dot(w_d, xaug_ref[...],
                      preferred_element_type=jnp.float32)         # (rows, T) f32
        if not last:
            if bf16_eplg:        # v6e / v7x: relu on bf16 (half the VALU work)
                act = jnp.maximum(acc.astype(jnp.bfloat16), 0)
            else:                # v5e: f32 VALU only
                act = jnp.maximum(acc, 0.0).astype(jnp.bfloat16)
            xaug_ref[:rows, :] = act        # 8-aligned rows -> unmasked store
        else:
            o_ref[0] = jnp.maximum(acc[:c_out, :], 0.0).astype(o_ref.dtype)


def init_params(key, in_channels, hidden_channels, out_channels, coords_dim, depth):
    """Per-layer (weight, bias) matching the PyTorch module construction:
    weight (C_out, C_in_total), bias (C_out,)."""
    dims = [(in_channels + coords_dim, hidden_channels)]
    dims += [(hidden_channels + coords_dim, hidden_channels)] * max(depth - 2, 0)
    dims += [(hidden_channels + coords_dim, out_channels)]
    params = []
    for cin_total, cout in dims:
        key, kw, kb = jax.random.split(key, 3)
        bound = 1.0 / math.sqrt(cin_total)
        w = jax.random.uniform(kw, (cout, cin_total), jnp.float32, -bound, bound)
        b = jax.random.uniform(kb, (cout,), jnp.float32, -bound, bound)
        params.append((w, b))
    return params


def pack_params(layer_params, coords_dim):
    """Pack the layers used by forward() into one augmented bf16 weight array.

    Column layout per layer row (matches the kernel's x_aug row layout):
      [0 : f_rows)                     feature inputs (zero padded)
      [f_rows : f_rows + coords_dim)   coords inputs
      [f_rows + coords_dim]            bias (multiplies the in-kernel ones row)
      remaining columns                zero pad
    Zero padding keeps the chain exact: padded rows/columns contribute 0.
    The weight BlockSpec is legal because its block equals the full array.
    """
    c_outs = [int(w.shape[0]) for w, _ in layer_params]
    c_in_feats = [int(w.shape[1]) - coords_dim for w, _ in layer_params]
    f_rows = _round_up(max(c_in_feats), 8)
    aug_pad = _round_up(coords_dim + 1, 8)
    k_aug = f_rows + aug_pad
    r_max = _round_up(max(c_outs), 8)
    depth = len(layer_params)

    w_all = jnp.zeros((depth, r_max, k_aug), jnp.float32)
    for d, (w_d, b_d) in enumerate(layer_params):
        cout, cin_feat = c_outs[d], c_in_feats[d]
        w_all = w_all.at[d, :cout, :cin_feat].set(w_d[:, :cin_feat])
        w_all = w_all.at[d, :cout, f_rows:f_rows + coords_dim].set(w_d[:, cin_feat:])
        w_all = w_all.at[d, :cout, f_rows + coords_dim].set(b_d)
    return w_all.astype(jnp.bfloat16), tuple(c_outs)


@functools.partial(jax.jit, static_argnames=("out_channels", "layer_rows",
                                             "tile_p", "bf16_epilogue"))
def conv1x1_multi_coords_decoder(theta, coords, w_packed, *, out_channels,
                                 layer_rows, tile_p=2048, bf16_epilogue=True):
    """theta: (N, C_in, H, W) f32, coords: (N, coords_dim, H, W) f32 (NCHW).
    Returns (N, out_channels, H, W) f32."""
    n, c_in, h, w = theta.shape
    c_crd = coords.shape[1]
    depth, r_max, k_aug = w_packed.shape
    hw = h * w

    # Divisor-aware lane-tile selection: minimize grid steps, then padding.
    hw128 = _round_up(hw, 128)
    cap = max(128, _round_up(min(tile_p, hw128), 128))
    if hw128 <= cap:
        tile = hw128
    else:
        def _key(t_cand):
            hwp = _round_up(hw, t_cand)
            return (hwp // t_cand, hwp - hw, -t_cand)
        tile = min(range(128, cap + 1, 128), key=_key)
    # v7x megacore: make sure both TensorCores get at least one grid step.
    while n * (_round_up(hw, tile) // tile) < 2 and tile > 128:
        tile = max(128, (tile // 2 // 128) * 128)
    hw_pad = _round_up(hw, tile)

    # Free metadata reshape; inputs stream as f32 (cast to bf16 inside the
    # kernel) so there is no extra HBM cast pass over the pixel data.
    x = theta.reshape(n, c_in, hw)
    c = coords.reshape(n, c_crd, hw)
    if hw_pad != hw:                       # only materialize a pad when needed
        x = jnp.pad(x, ((0, 0), (0, 0), (0, hw_pad - hw)))
        c = jnp.pad(c, ((0, 0), (0, 0), (0, hw_pad - hw)))

    grid = (n, hw_pad // tile)
    kernel = functools.partial(_fused_decoder_kernel, layer_rows=layer_rows,
                               c_out=out_channels, bf16_eplg=bf16_epilogue)

    out = pl.pallas_call(
        kernel,
        out_shape=jax.ShapeDtypeStruct((n, out_channels, hw_pad), jnp.float32),
        grid_spec=pltpu.PrefetchScalarGridSpec(
            num_scalar_prefetch=0,
            grid=grid,
            in_specs=[
                pl.BlockSpec((1, c_in, tile), lambda b, i: (b, 0, i)),
                pl.BlockSpec((1, c_crd, tile), lambda b, i: (b, 0, i)),
                # All layers' weights: block == full array, constant index_map
                # -> DMA'd once, resident in VMEM for every grid step.
                pl.BlockSpec((depth, r_max, k_aug), lambda b, i: (0, 0, 0)),
            ],
            out_specs=pl.BlockSpec((1, out_channels, tile), lambda b, i: (b, 0, i)),
            scratch_shapes=[pltpu.VMEM((k_aug, tile), jnp.bfloat16)],
        ),
        compiler_params=pltpu.CompilerParams(
            dimension_semantics=("parallel", "parallel"),
        ),
    )(x, c, w_packed)

    return out[:, :, :hw].reshape(n, out_channels, h, w)


def _reference(theta, coords, layer_params):
    """Pure-JAX reference for the PyTorch forward, emulating the kernel's
    bf16 rounding of inputs / weights / bias / inter-layer activations
    (all accumulation stays f32)."""
    q = lambda a: a.astype(jnp.bfloat16).astype(jnp.float32)
    x = q(theta)
    c = q(coords)
    n_layers = len(layer_params)
    for d, (w, b) in enumerate(layer_params):
        inp = jnp.concatenate([x, c], axis=1)
        y = jnp.einsum("nchw,oc->nohw", inp, q(w),
                       precision=jax.lax.Precision.HIGHEST)
        y = y + q(b).reshape(1, -1, 1, 1)
        y = jnp.maximum(y, 0.0)
        x = q(y) if d + 1 < n_layers else y
    return x


if __name__ == "__main__":
    # Small shapes consistent with the module.
    N, H, W = 2, 16, 16
    in_channels, hidden_channels, out_channels = 4, 32, 3
    coords_dim, depth = 2, 4

    key = jax.random.PRNGKey(0)
    k_theta, k_coords, k_params = jax.random.split(key, 3)

    theta = jax.random.normal(k_theta, (N, in_channels, H, W), jnp.float32)
    coords = jax.random.normal(k_coords, (N, coords_dim, H, W), jnp.float32)

    layer_params = init_params(k_params, in_channels, hidden_channels,
                               out_channels, coords_dim, depth)
    # forward() only uses the first `depth` convs (matters only for depth < 2).
    used_layers = layer_params[:depth]
    w_packed, layer_rows = pack_params(used_layers, coords_dim)
    out_c = layer_rows[-1]

    out = conv1x1_multi_coords_decoder(
        theta, coords, w_packed, out_channels=out_c, layer_rows=layer_rows,
        bf16_epilogue=_default_bf16_epilogue())
    out = jax.block_until_ready(out)

    ref = _reference(theta, coords, used_layers)
    assert out.shape == (N, out_c, H, W), out.shape
    max_err = float(jnp.max(jnp.abs(out - ref)))
    assert jnp.allclose(out, ref, atol=3e-3, rtol=3e-3), f"mismatch: {max_err}"

    print("KERNEL_OK")
</pallas_src>

<mosaic_0001>
module attributes {stable_mosaic.version = 11 : i64} {
  func.func @_fused_decoder_kernel(%arg0: i32, %arg1: i32, %arg2: memref<1x4x256xf32, #tpu.memory_space<vmem>>, %arg3: memref<1x2x256xf32, #tpu.memory_space<vmem>>, %arg4: memref<4x32x40xbf16, #tpu.memory_space<vmem>>, %arg5: memref<1x3x256xf32, #tpu.memory_space<vmem>>, %arg6: memref<40x256xbf16, #tpu.memory_space<vmem>>) attributes {dimension_semantics = [#tpu.dimension_semantics<parallel>, #tpu.dimension_semantics<parallel>], iteration_bounds = array<i64: 2, 1>, scalar_prefetch = 0 : i64, scratch_operands = 1 : i64, tpu.core_type = #tpu.core_type<tc>, window_params = [{transform_indices = @transform_0, window_bounds = array<i64: 1, 4, 256>}, {transform_indices = @transform_1, window_bounds = array<i64: 1, 2, 256>}, {pipeline_mode = #tpu.pipeline_mode<synchronous>, transform_indices = @transform_2, window_bounds = array<i64: 4, 32, 40>}, {transform_indices = @transform_3, window_bounds = array<i64: 1, 3, 256>}]} {
    %c0 = arith.constant 0 : index
    %c0_0 = arith.constant 0 : index
    %c0_1 = arith.constant 0 : index
    %0 = vector.load %arg2[%c0, %c0_0, %c0_1] : memref<1x4x256xf32, #tpu.memory_space<vmem>>, vector<1x4x256xf32>
    %1 = vector.shape_cast %0 : vector<1x4x256xf32> to vector<4x256xf32>
    %cst = arith.constant 0.000000e+00 : f32
    %2 = vector.broadcast %cst : f32 to vector<28x256xf32>
    %3 = tpu.concatenate %1, %2 in 0 : vector<4x256xf32>, vector<28x256xf32> -> vector<32x256xf32>
    %4 = arith.truncf %3 : vector<32x256xf32> to vector<32x256xbf16>
    %c0_2 = arith.constant 0 : index
    %c0_3 = arith.constant 0 : index
    %5 = vector.load %arg6[%c0_2, %c0_3] : memref<40x256xbf16, #tpu.memory_space<vmem>>, vector<32x256xbf16>
    tpu.vector_store %arg6[%c0_2, %c0_3], %4 {strides = array<i32>} : memref<40x256xbf16, #tpu.memory_space<vmem>>, vector<32x256xbf16>,
    %c0_4 = arith.constant 0 : index
    %c0_5 = arith.constant 0 : index
    %c0_6 = arith.constant 0 : index
    %6 = vector.load %arg3[%c0_4, %c0_5, %c0_6] : memref<1x2x256xf32, #tpu.memory_space<vmem>>, vector<1x2x256xf32>
    %7 = vector.shape_cast %6 : vector<1x2x256xf32> to vector<2x256xf32>
    %cst_7 = arith.constant 1.000000e+00 : f32
    %8 = vector.broadcast %cst_7 : f32 to vector<1x256xf32>
    %9 = tpu.concatenate %7, %8 in 0 : vector<2x256xf32>, vector<1x256xf32> -> vector<3x256xf32>
    %cst_8 = arith.constant 0.000000e+00 : f32
    %10 = vector.broadcast %cst_8 : f32 to vector<5x256xf32>
    %11 = tpu.concatenate %9, %10 in 0 : vector<3x256xf32>, vector<5x256xf32> -> vector<8x256xf32>
    %12 = arith.truncf %11 : vector<8x256xf32> to vector<8x256xbf16>
    %c32 = arith.constant 32 : index
    %c0_9 = arith.constant 0 : index
    %13 = vector.load %arg6[%c32, %c0_9] : memref<40x256xbf16, #tpu.memory_space<vmem>>, vector<8x256xbf16>
    tpu.vector_store %arg6[%c32, %c0_9], %12 {strides = array<i32>} : memref<40x256xbf16, #tpu.memory_space<vmem>>, vector<8x256xbf16>,
    %c0_10 = arith.constant 0 : index
    %c0_11 = arith.constant 0 : index
    %c0_12 = arith.constant 0 : index
    %14 = vector.load %arg4[%c0_10, %c0_11, %c0_12] : memref<4x32x40xbf16, #tpu.memory_space<vmem>>, vector<1x32x40xbf16>
    %15 = vector.shape_cast %14 : vector<1x32x40xbf16> to vector<32x40xbf16>
    %c0_13 = arith.constant 0 : index
    %c0_14 = arith.constant 0 : index
    %16 = vector.load %arg6[%c0_13, %c0_14] : memref<40x256xbf16, #tpu.memory_space<vmem>>, vector<40x256xbf16>
    %cst_15 = arith.constant dense<0.000000e+00> : vector<32x256xf32>
    %17 = tpu.matmul %15, %16, %cst_15 {dimension_numbers = #tpu.dot_dimension_numbers<[1], [0], [0], [1], [0, 0, 1, 1], [], []>} : vector<32x40xbf16>, vector<40x256xbf16>, vector<32x256xf32> -> vector<32x256xf32>
    %18 = arith.truncf %17 : vector<32x256xf32> to vector<32x256xbf16>
    %cst_16 = arith.constant 0.000000e+00 : bf16
    %19 = vector.broadcast %cst_16 : bf16 to vector<32x256xbf16>
    %20 = arith.maximumf %18, %19 : vector<32x256xbf16>
    %c0_17 = arith.constant 0 : index
    %c0_18 = arith.constant 0 : index
    %21 = vector.load %arg6[%c0_17, %c0_18] : memref<40x256xbf16, #tpu.memory_space<vmem>>, vector<32x256xbf16>
    tpu.vector_store %arg6[%c0_17, %c0_18], %20 {strides = array<i32>} : memref<40x256xbf16, #tpu.memory_space<vmem>>, vector<32x256xbf16>,
    %c1 = arith.constant 1 : index
    %c0_19 = arith.constant 0 : index
    %c0_20 = arith.constant 0 : index
    %22 = vector.load %arg4[%c1, %c0_19, %c0_20] : memref<4x32x40xbf16, #tpu.memory_space<vmem>>, vector<1x32x40xbf16>
    %23 = vector.shape_cast %22 : vector<1x32x40xbf16> to vector<32x40xbf16>
    %c0_21 = arith.constant 0 : index
    %c0_22 = arith.constant 0 : index
    %24 = vector.load %arg6[%c0_21, %c0_22] : memref<40x256xbf16, #tpu.memory_space<vmem>>, vector<40x256xbf16>
    %cst_23 = arith.constant dense<0.000000e+00> : vector<32x256xf32>
    %25 = tpu.matmul %23, %24, %cst_23 {dimension_numbers = #tpu.dot_dimension_numbers<[1], [0], [0], [1], [0, 0, 1, 1], [], []>} : vector<32x40xbf16>, vector<40x256xbf16>, vector<32x256xf32> -> vector<32x256xf32>
    %26 = arith.truncf %25 : vector<32x256xf32> to vector<32x256xbf16>
    %cst_24 = arith.constant 0.000000e+00 : bf16
    %27 = vector.broadcast %cst_24 : bf16 to vector<32x256xbf16>
    %28 = arith.maximumf %26, %27 : vector<32x256xbf16>
    %c0_25 = arith.constant 0 : index
    %c0_26 = arith.constant 0 : index
    %29 = vector.load %arg6[%c0_25, %c0_26] : memref<40x256xbf16, #tpu.memory_space<vmem>>, vector<32x256xbf16>
    tpu.vector_store %arg6[%c0_25, %c0_26], %28 {strides = array<i32>} : memref<40x256xbf16, #tpu.memory_space<vmem>>, vector<32x256xbf16>,
    %c2 = arith.constant 2 : index
    %c0_27 = arith.constant 0 : index
    %c0_28 = arith.constant 0 : index
    %30 = vector.load %arg4[%c2, %c0_27, %c0_28] : memref<4x32x40xbf16, #tpu.memory_space<vmem>>, vector<1x32x40xbf16>
    %31 = vector.shape_cast %30 : vector<1x32x40xbf16> to vector<32x40xbf16>
    %c0_29 = arith.constant 0 : index
    %c0_30 = arith.constant 0 : index
    %32 = vector.load %arg6[%c0_29, %c0_30] : memref<40x256xbf16, #tpu.memory_space<vmem>>, vector<40x256xbf16>
    %cst_31 = arith.constant dense<0.000000e+00> : vector<32x256xf32>
    %33 = tpu.matmul %31, %32, %cst_31 {dimension_numbers = #tpu.dot_dimension_numbers<[1], [0], [0], [1], [0, 0, 1, 1], [], []>} : vector<32x40xbf16>, vector<40x256xbf16>, vector<32x256xf32> -> vector<32x256xf32>
    %34 = arith.truncf %33 : vector<32x256xf32> to vector<32x256xbf16>
    %cst_32 = arith.constant 0.000000e+00 : bf16
    %35 = vector.broadcast %cst_32 : bf16 to vector<32x256xbf16>
    %36 = arith.maximumf %34, %35 : vector<32x256xbf16>
    %c0_33 = arith.constant 0 : index
    %c0_34 = arith.constant 0 : index
    %37 = vector.load %arg6[%c0_33, %c0_34] : memref<40x256xbf16, #tpu.memory_space<vmem>>, vector<32x256xbf16>
    tpu.vector_store %arg6[%c0_33, %c0_34], %36 {strides = array<i32>} : memref<40x256xbf16, #tpu.memory_space<vmem>>, vector<32x256xbf16>,
    %c3 = arith.constant 3 : index
    %c0_35 = arith.constant 0 : index
    %c0_36 = arith.constant 0 : index
    %38 = vector.load %arg4[%c3, %c0_35, %c0_36] : memref<4x32x40xbf16, #tpu.memory_space<vmem>>, vector<1x32x40xbf16>
    %39 = vector.shape_cast %38 : vector<1x32x40xbf16> to vector<32x40xbf16>
    %40 = vector.extract_strided_slice %39 {offsets = [0, 0], sizes = [8, 40], strides = [1, 1]} : vector<32x40xbf16> to vector<8x40xbf16>
    %c0_37 = arith.constant 0 : index
    %c0_38 = arith.constant 0 : index
    %41 = vector.load %arg6[%c0_37, %c0_38] : memref<40x256xbf16, #tpu.memory_space<vmem>>, vector<40x256xbf16>
    %cst_39 = arith.constant dense<0.000000e+00> : vector<8x256xf32>
    %42 = tpu.matmul %40, %41, %cst_39 {dimension_numbers = #tpu.dot_dimension_numbers<[1], [0], [0], [1], [0, 0, 1, 1], [], []>} : vector<8x40xbf16>, vector<40x256xbf16>, vector<8x256xf32> -> vector<8x256xf32>
    %43 = vector.extract_strided_slice %42 {offsets = [0, 0], sizes = [3, 256], strides = [1, 1]} : vector<8x256xf32> to vector<3x256xf32>
    %cst_40 = arith.constant 0.000000e+00 : f32
    %44 = vector.broadcast %cst_40 : f32 to vector<3x256xf32>
    %45 = arith.maximumf %43, %44 : vector<3x256xf32>
    %c0_41 = arith.constant 0 : index
    %c0_42 = arith.constant 0 : index
    %c0_43 = arith.constant 0 : index
    %46 = vector.load %arg5[%c0_41, %c0_42, %c0_43] : memref<1x3x256xf32, #tpu.memory_space<vmem>>, vector<1x3x256xf32>
    %47 = vector.shape_cast %46 : vector<1x3x256xf32> to vector<3x256xf32>
    %48 = vector.shape_cast %45 : vector<3x256xf32> to vector<1x3x256xf32>
    tpu.vector_store %arg5[%c0_41, %c0_42, %c0_43], %48 {strides = array<i32>} : memref<1x3x256xf32, #tpu.memory_space<vmem>>, vector<1x3x256xf32>,
    return
  }
  func.func @transform_0(%arg0: i32, %arg1: i32) -> (i32, i32, i32) {
    %c0_i32 = arith.constant 0 : i32
    %c0_i32_0 = arith.constant 0 : i32
    return %arg0, %c0_i32, %arg1 : i32, i32, i32
  }
  func.func @transform_1(%arg0: i32, %arg1: i32) -> (i32, i32, i32) {
    %c0_i32 = arith.constant 0 : i32
    %c0_i32_0 = arith.constant 0 : i32
    return %arg0, %c0_i32, %arg1 : i32, i32, i32
  }
  func.func @transform_2(%arg0: i32, %arg1: i32) -> (i32, i32, i32) {
    %c0_i32 = arith.constant 0 : i32
    %c0_i32_0 = arith.constant 0 : i32
    %c0_i32_1 = arith.constant 0 : i32
    %c0_i32_2 = arith.constant 0 : i32
    return %c0_i32, %c0_i32_0, %c0_i32_1 : i32, i32, i32
  }
  func.func @transform_3(%arg0: i32, %arg1: i32) -> (i32, i32, i32) {
    %c0_i32 = arith.constant 0 : i32
    %c0_i32_0 = arith.constant 0 : i32
    return %arg0, %c0_i32, %arg1 : i32, i32, i32
  }
}

</mosaic_0001>

<bundles_post_ra>
// kernel: conv1x1_multi_coords_decoder.1
= control target key start
LH: loop header
LB: loop body
LE: loop exit
PB: predicated region body
PF: predicated region fallthrough
CT: control target
= control target key end

     0   :  { %s1093_s12 = smov 0   ;;  %s1095_s13 = smov 0   ;;  %s1203_s0 = inlined_call_operand.vmem [shape: f32[2,4,256], index: 0, kind: input, shape index: {}]   ;;  %s1204_s1 = inlined_call_operand.vmem [shape: f32[2,2,256], index: 1, kind: input, shape index: {}]   ;;  %s1205_s2 = inlined_call_operand.vmem [shape: bf16[4,32,40], index: 2, kind: input, shape index: {}]   ;;  %s1206_s3 = inlined_call_operand.vmem [shape: f32[2,3,256], index: 3, kind: output, shape index: {}]  }
   0x1   :  { %s1097_s14 = smov 0  }
   0x2 LB: > { %s25_s15 = sadd.s32 1, %s1065_s13  ;;  %p929_p0 = scmp.ge.s32.totalorder %s1069_s14, 1  ;;  %s1069_s14 = sphi %s1097_s14, %s13_s14   ;;  %s1065_s13 = sphi %s1095_s13, %s1208_s13   ;;  %s1061_s12 = sphi %s1093_s12, %s1207_s12  }
   0x3   : > { %p27_p1 = scmp.ge.s32.totalorder %s25_s15, 2  ;;  %p175_p2 = scmp.lt.s32.totalorder %s1069_s14, 3 }
   0x5   : > { %s1210_s15 = smov (%p27_p1, %s25_s15), 0  ;;  %p176_p3 = pnand %p929_p0, %p175_p2 }
   0x6   : > { %p217_p4 = scmp.lt.s32.totalorder (!%p176_p3), %s1061_s12, 1  ;;  %vm251_vm0 = vcmask (!%p176_p3), 1043456   ;;  %v1071_v0 = vmov (!%p176_p3), 0   ;;  %vm290_vm1 = vcmask (!%p176_p3), 1041408   ;;  %vm293_vm2 = vcmask (!%p176_p3), 1042432   ;;  %v1041_v18 = vld [vmem:[%s1205_s2] sm:$0xff] (!%p176_p3)  }
   0x7   : > { %179 = sbr.rel (%p176_p3) target bundleno = 960 (0x3c0), region = 32  ;;  %394 = vmatprep.mubr.bf16.mxu0 (!%p176_p3), %v1071_v0  ;;  %536 = vmatprep.mubr.bf16.mxu1 (!%p176_p3), %v1071_v0  ;;  %v1072_v10 = vmov (!%p176_p3), 0.0|0.0   ;;  %vm349_vm3 = vcmask (!%p176_p3), 326656   ;;  %v1042_v19 = vld [vmem:[%s1205_s2 + $0x8] sm:$0xff] (!%p176_p3)   ;;  %v1043_v36 = vld [vmem:[%s1205_s2 + $0x10] sm:$0xff] (!%p176_p3)   ;;  %v1044_v37 = vld [vmem:[%s1205_s2 + $0x18] sm:$0xff] (!%p176_p3)  }
   0x8   : > { %v1045_v54 = vld [vmem:[%s1205_s2 + $0x20] sm:$0xff] (!%p176_p3)   ;;  %v1046_v55 = vld [vmem:[%s1205_s2 + $0x28] sm:$0xff] (!%p176_p3)  }
   0xe   : > { %s1212_s12 = smov (!%p217_p4, %s1061_s12), 1 }
   0xf   : > { %s1006_s16 = sshll.u32 %s1212_s12, 3  ;;  %s1007_s17 = sshll.u32 %s1212_s12, 2 }
  0x10   : > { %s224_s20 = scalar_lea.vmem %s1203_s0, %s1006_s16  ;;  %s234_s23 = scalar_lea.vmem %s1204_s1, %s1007_s17 }
  0x11   : > { %v247_v1 = vld [vmem:[%s224_s20] sm:$0xff]  ;;  %s244_s18 = scalar_lea.vmem %s1206_s3, %s1006_s16 }
  0x12   : > { %v940_v2 = vld.sshfl [vmem:[%s234_s23] sm:$0x33 pattern:$0x76325410]  ;;  %v249_v3 = vcombine.high %v247_v1, %v247_v1  ;;  %v252_v4 = vsel %vm251_vm0, %v247_v1, 0.0 }
  0x13   : > { %v287_v5 = vcombine.high %v940_v2, %v940_v2  ;;  %v291_v9 = vsel %vm290_vm1, %v940_v2, 1.0 }
  0x14   : > { %v253_v6 = vsel %vm251_vm0, %v249_v3, 0.0  ;;  %v294_v14 = vsel %vm293_vm2, %v291_v9, 0.0  ;;  %v995_v9 = vld [vmem:[%s1205_s2 + $0x30] sm:$0xf] }
  0x15   : > { %v1009_v7 = vpack.c.bf16 %v253_v6, %v252_v4  ;;  %v292_v8 = vsel %vm290_vm1, %v287_v5, 1.0  ;;  %v1012_v16 = vpack.c.bf16 %v294_v14, %v294_v14 }
  0x16   : > { %v295_v13 = vsel %vm293_vm2, %v292_v8, 0.0 }
  0x17   : > { %v945_v11 = vcombine.high %v1009_v7, %v1072_v10  ;;  %v944_v12 = vcombine.low %v1009_v7, %v1072_v10  ;;  %v1127_v15 = vpack.c.bf16 %v295_v13, %v295_v13  ;;  %v1132_v17 = vsel %vm251_vm0, %v1012_v16, 0 }
  0x19   : > { %362 = vmatprep.subr.bf16.mxu0 %v945_v11 }
  0x1a   : > { %363 = vmatpush1.bf16.msra.mxu0 %v944_v12 }
  0x1b   : > { %364 = vmatprep.subr.bf16.mxu0 %v1072_v10 }
  0x1e   : > { %365 = vmatpush1.bf16.msra.mxu0 %v1072_v10 }
  0x1f   : > { %950 = vmatprep.subr.msk.bf16.mxu0 %vm251_vm0, %v1127_v15 }
  0x22   : > { %367 = vmatpush1.bf16.msra.mxu0 %v1132_v17 }
  0x25   : > { %951 = vmatmul.mubr.msk.bf16.vlgmr.msra.gmra.mrb[0].mxu0 %vm349_vm3, %v1041_v18 }
  0x26   : > { %404 = vmatprep.mubr.bf16.mxu0 %v1071_v0 }
  0x2d   : > { %952 = vmatmul.mubr.msk.bf16.gmra.mrb[4].mxu0 %vm349_vm3, %v1042_v19 }
  0x2e   : > { %678 = vmatprep.mubr.bf16.mxu0 %v1071_v0 }
  0xf8   : > { %v396_v20 = vpop.f32.mrb[0].mxu0 }
  0xf9   : > { %v398_v21 = vpop.f32.mrb[1].mxu0 }
  0xfa   : > { %v400_v22 = vpop.f32.mrb[2].mxu0 }
  0xfb   : > { %v415_v23 = vpack.c.bf16 %v400_v22, %v396_v20  ;;  %v402_v24 = vpop.f32.mrb[3].mxu0 }
  0xfc   : > { %v416_v25 = vpack.c.bf16 %v402_v24, %v398_v21 }
  0xfd   : > { %v419_v27 = vmax.bf16 %v1071_v0, %v415_v23 }
  0xfe   : > { %v420_v26 = vmax.bf16 %v1071_v0, %v416_v25 }
 0x100   : > { %v406_v28 = vpop.f32.mrb[4].mxu0  ;;  %504 = vmatprep.subr.bf16.mxu1 %v420_v26 }
 0x101   : > { %v408_v29 = vpop.f32.mrb[5].mxu0  ;;  %505 = vmatpush1.bf16.msra.mxu1 %v419_v27 }
 0x102   : > { %v410_v30 = vpop.f32.mrb[6].mxu0 }
 0x103   : > { %v417_v31 = vpack.c.bf16 %v410_v30, %v406_v28  ;;  %v412_v32 = vpop.f32.mrb[7].mxu0 }
 0x104   : > { %v418_v33 = vpack.c.bf16 %v412_v32, %v408_v29 }
 0x105   : > { %v421_v35 = vmax.bf16 %v1071_v0, %v417_v31 }
 0x106   : > { %v422_v34 = vmax.bf16 %v1071_v0, %v418_v33 }
 0x108   : > { %506 = vmatprep.subr.bf16.mxu1 %v422_v34 }
 0x109   : > { %507 = vmatpush1.bf16.msra.mxu1 %v421_v35 }
 0x10a   : > { %969 = vmatprep.subr.msk.bf16.mxu1 %vm251_vm0, %v1127_v15 }
 0x10d   : > { %509 = vmatpush1.bf16.msra.mxu1 %v1132_v17 }
 0x110   : > { %970 = vmatmul.mubr.msk.bf16.vlgmr.msra.gmra.mrb[0].mxu1 %vm349_vm3, %v1043_v36 }
 0x111   : > { %546 = vmatprep.mubr.bf16.mxu1 %v1071_v0 }
 0x118   : > { %971 = vmatmul.mubr.msk.bf16.gmra.mrb[4].mxu1 %vm349_vm3, %v1044_v37 }
 0x119   : > { %804 = vmatprep.mubr.bf16.mxu1 %v1071_v0 }
 0x1e3   : > { %v538_v38 = vpop.f32.mrb[0].mxu1 }
 0x1e4   : > { %v540_v39 = vpop.f32.mrb[1].mxu1 }
 0x1e5   : > { %v542_v40 = vpop.f32.mrb[2].mxu1 }
 0x1e6   : > { %v557_v41 = vpack.c.bf16 %v542_v40, %v538_v38  ;;  %v544_v42 = vpop.f32.mrb[3].mxu1 }
 0x1e7   : > { %v558_v43 = vpack.c.bf16 %v544_v42, %v540_v39 }
 0x1e8   : > { %v561_v45 = vmax.bf16 %v1071_v0, %v557_v41 }
 0x1e9   : > { %v562_v44 = vmax.bf16 %v1071_v0, %v558_v43 }
 0x1eb   : > { %v548_v46 = vpop.f32.mrb[4].mxu1  ;;  %646 = vmatprep.subr.bf16.mxu0 %v562_v44 }
 0x1ec   : > { %v550_v47 = vpop.f32.mrb[5].mxu1  ;;  %647 = vmatpush1.bf16.msra.mxu0 %v561_v45 }
 0x1ed   : > { %v552_v48 = vpop.f32.mrb[6].mxu1 }
 0x1ee   : > { %v559_v49 = vpack.c.bf16 %v552_v48, %v548_v46  ;;  %v554_v50 = vpop.f32.mrb[7].mxu1 }
 0x1ef   : > { %v560_v51 = vpack.c.bf16 %v554_v50, %v550_v47 }
 0x1f0   : > { %v563_v53 = vmax.bf16 %v1071_v0, %v559_v49 }
 0x1f1   : > { %v564_v52 = vmax.bf16 %v1071_v0, %v560_v51 }
 0x1f3   : > { %648 = vmatprep.subr.bf16.mxu0 %v564_v52 }
 0x1f4   : > { %649 = vmatpush1.bf16.msra.mxu0 %v563_v53 }
 0x1f5   : > { %988 = vmatprep.subr.msk.bf16.mxu0 %vm251_vm0, %v1127_v15 }
 0x1f8   : > { %651 = vmatpush1.bf16.msra.mxu0 %v1132_v17 }
 0x1fb   : > { %989 = vmatmul.mubr.msk.bf16.vlgmr.msra.gmra.mrb[8].mxu0 %vm349_vm3, %v1045_v54 }
 0x1fc   : > { %688 = vmatprep.mubr.bf16.mxu0 %v1071_v0 }
 0x203   : > { %990 = vmatmul.mubr.msk.bf16.gmra.mrb[12].mxu0 %vm349_vm3, %v1046_v55 }
 0x2ce   : > { %v680_v56 = vpop.f32.mrb[8].mxu0 }
 0x2cf   : > { %v682_v57 = vpop.f32.mrb[9].mxu0 }
 0x2d0   : > { %v684_v58 = vpop.f32.mrb[10].mxu0 }
 0x2d1   : > { %v699_v59 = vpack.c.bf16 %v684_v58, %v680_v56  ;;  %v686_v60 = vpop.f32.mrb[11].mxu0 }
 0x2d2   : > { %v700_v61 = vpack.c.bf16 %v686_v60, %v682_v57 }
 0x2d3   : > { %v703_v63 = vmax.bf16 %v1071_v0, %v699_v59 }
 0x2d4   : > { %v704_v62 = vmax.bf16 %v1071_v0, %v700_v61 }
 0x2d6   : > { %v690_v1 = vpop.f32.mrb[12].mxu0  ;;  %772 = vmatprep.subr.bf16.mxu1 %v704_v62 }
 0x2d7   : > { %v692_v2 = vpop.f32.mrb[13].mxu0  ;;  %773 = vmatpush1.bf16.msra.mxu1 %v703_v63 }
 0x2d8   : > { %v694_v3 = vpop.f32.mrb[14].mxu0 }
 0x2d9   : > { %v701_v4 = vpack.c.bf16 %v694_v3, %v690_v1  ;;  %v696_v5 = vpop.f32.mrb[15].mxu0 }
 0x2da   : > { %v702_v6 = vpack.c.bf16 %v696_v5, %v692_v2 }
 0x2db   : > { %v705_v8 = vmax.bf16 %v1071_v0, %v701_v4 }
 0x2dc   : > { %v706_v7 = vmax.bf16 %v1071_v0, %v702_v6 }
 0x2de   : > { %774 = vmatprep.subr.bf16.mxu1 %v706_v7 }
 0x2df   : > { %775 = vmatpush1.bf16.msra.mxu1 %v705_v8 }
 0x2e0   : > { %1002 = vmatprep.subr.msk.bf16.mxu1 %vm251_vm0, %v1127_v15 }
 0x2e3   : > { %777 = vmatpush1.bf16.msra.mxu1 %v1132_v17 }
 0x2e6   : > { %1003 = vmatmul.mubr.msk.bf16.vlgmr.msra.gmra.mrb[8].mxu1 %vm349_vm3, %v995_v9 }
 0x3b9   : > { %v806_v10 = vpop.f32.mrb[8].mxu1 }
 0x3ba   : > { %v813_v11 = vmax.f32 %v806_v10, 0.0  ;;  %v808_v12 = vpop.f32.mrb[9].mxu1 }
 0x3bb   : > { %v814_v13 = vmax.f32 %v808_v12, 0.0  ;;  %v810_v14 = vpop.f32.mrb[10].mxu1 }
 0x3bc   : > { %v811_v0 = vpop.f32.mrb[11].mxu1 }
 0x3bd   : > { %v817_v15 = vcombine.low %v813_v11, %v814_v13 }
 0x3bf   : > { %819 = vst [vmem:[%s244_s18] sm:$0x77] %v817_v15 }
 0x3c0 PF: > { %s13_s14 = sadd.s32 1, %s1069_s14   ;;  %s1207_s12 = smov %s1065_s13 }
 0x3c1   : > { %p10_p5 = scmp.ge.s32.totalorder %s13_s14, 4   ;;  %s1208_s13 = smov %s1210_s15 }
 0x3c3   :  { %12 = sbr.rel (!%p10_p5) target bundleno = 2 (0x2), region = 68 }

</bundles_post_ra>
